<compile_context>
chip_gen: v7x
topology: tpu7x:2x2x1
jax: 0.10.0
libtpu: 0.0.40
codegen_flags: <defaults>
</compile_context>

<pallas_src>
import jax
import jax.numpy as jnp
from jax.experimental import pallas as pl
from jax.experimental.pallas import tpu as pltpu

_MiB = 1024 * 1024
# Minimum sublane tile per element size (f32 -> 8, bf16 -> 16, int8/fp8 -> 32).
_SUBLANE_MIN = {4: 8, 2: 16, 1: 32}


def _round_up(a, b):
    return ((a + b - 1) // b) * b


# ------------------------------- kernels ------------------------------------


def _make_noacc_kernel(compute_dtype):
    """K untiled: one MXU dot per output tile + f32 bias epilogue, no scratch."""

    def kernel(x_ref, w_ref, b_ref, o_ref):
        x = x_ref[...].astype(compute_dtype)  # in-kernel cast rides the VPU slot
        out = jnp.dot(x, w_ref[...], preferred_element_type=jnp.float32)
        o_ref[...] = (out + b_ref[...].astype(jnp.float32)).astype(o_ref.dtype)

    return kernel


def _make_acc_kernel(compute_dtype):
    """K tiled (innermost grid axis): f32 VMEM accumulator, bias on flush."""

    def kernel(x_ref, w_ref, b_ref, o_ref, acc_ref):
        k = pl.program_id(2)
        x = x_ref[...].astype(compute_dtype)
        part = jnp.dot(x, w_ref[...], preferred_element_type=jnp.float32)

        @pl.when(k == 0)
        def _init():
            acc_ref[...] = part  # write, not zero-then-accumulate

        @pl.when(k > 0)
        def _accum():
            acc_ref[...] += part

        @pl.when(k == pl.num_programs(2) - 1)
        def _store():
            o_ref[...] = (
                acc_ref[...] + b_ref[...].astype(jnp.float32)
            ).astype(o_ref.dtype)

    return kernel


# ------------------------------- wrapper ------------------------------------


def _vmem_capacity_and_budget():
    cap = 128 * _MiB
    try:
        info = pltpu.get_tpu_info()
        cap = int(getattr(info, "vmem_capacity_bytes", cap) or cap)
    except Exception:
        pass
    if cap <= 64 * _MiB:  # v7x-class: 64 MiB per TensorCore
        budget = int(cap * 0.75)  # ~48 MiB, leave compiler-scratch headroom
    else:  # v5e / v6e: 128 MiB
        budget = min(int(cap * 0.80), 100 * _MiB)
    return cap, budget


def conv1d(x, weight, bias, *, tm=None, tn=None, tk=None, mxu_dtype="auto"):
    """GPT-2 Conv1D forward: y = x @ weight + bias, weight shape (nx, nf).

    mxu_dtype: "auto" (bf16 MXU operands for f32 inputs, f32 accumulate),
               None (keep the input dtype on the MXU), or an explicit dtype.
    """
    nx, nf = weight.shape
    assert x.shape[-1] == nx, (x.shape, weight.shape)
    lead_shape = x.shape[:-1]
    out_dtype = x.dtype

    x2d = x.reshape(-1, nx)
    m = x2d.shape[0]

    if mxu_dtype == "auto":
        compute_dtype = jnp.bfloat16 if x2d.dtype == jnp.float32 else x2d.dtype
    elif mxu_dtype is None:
        compute_dtype = x2d.dtype
    else:
        compute_dtype = jnp.dtype(mxu_dtype)

    # One-time weight cast in the wrapper; activations are cast in-kernel so
    # the wrapper does not add an extra HBM pass over x.
    w = weight if weight.dtype == jnp.dtype(compute_dtype) else weight.astype(compute_dtype)
    bias2d = bias.reshape(1, nf)

    x_item = jnp.dtype(x2d.dtype).itemsize
    w_item = jnp.dtype(w.dtype).itemsize
    o_item = jnp.dtype(out_dtype).itemsize
    b_item = jnp.dtype(bias2d.dtype).itemsize
    sub_min = _SUBLANE_MIN.get(x_item, 8)

    cap, budget = _vmem_capacity_and_budget()

    # ---------------- tile / schedule selection ------------------------------
    def vmem_use(tm_, tn_, tk_, k_tiled):
        use = (
            2 * tm_ * tk_ * x_item      # x tiles (double-buffered)
            + 2 * tk_ * tn_ * w_item    # weight tiles
            + 2 * 1 * tn_ * b_item      # bias tiles
            + 2 * tm_ * tn_ * o_item    # output tiles
        )
        if k_tiled:
            use += tm_ * tn_ * 4        # f32 accumulator scratch
        return use

    def shrink_tm(tm_req, tn_, tk_, k_tiled):
        tm_ = min(_round_up(tm_req, sub_min), _round_up(m, sub_min))
        tm_ = max(tm_, sub_min)
        while tm_ > sub_min and vmem_use(tm_, tn_, tk_, k_tiled) > budget:
            tm_ = max(sub_min, _round_up(tm_ // 2, sub_min))
        return tm_

    # K tile: keep the contraction untiled unless explicitly requested; only
    # exact 128-multiple divisors of nx are ever used (padded K would corrupt
    # the accumulation).
    if tk is not None and 0 < tk < nx and nx % tk == 0 and tk % 128 == 0:
        tk_eff = tk
    else:
        tk_eff = nx

    # N tile candidates: full nf first (enables weight residency), then
    # lane-dense 128-multiples that divide nf, then ragged fallbacks (masked
    # stores on the last tile -- correct, slightly slower epilogue).
    if tn is not None:
        tn_list = [nf if tn >= nf else max(128, (tn // 128) * 128)]
    else:
        tn_list = [nf]
        tn_list += [c for c in (4096, 2048, 1024, 512, 256, 128)
                    if c < nf and nf % c == 0]
        tn_list += [c for c in (512, 256, 128) if c < nf and c not in tn_list]

    chosen = None
    for tn_try in tn_list:
        k_tiled_try = tk_eff < nx
        resident_try = (tn_try == nf) and not k_tiled_try
        # Bigger M tile when the weight must be re-streamed (amortizes re-reads).
        tm_req = tm if tm is not None else (512 if resident_try else 1024)
        tm_try = shrink_tm(tm_req, tn_try, tk_eff, k_tiled_try)
        if vmem_use(tm_try, tn_try, tk_eff, k_tiled_try) <= budget:
            chosen = (tm_try, tn_try, tk_eff, k_tiled_try)
            break

    if chosen is None:
        # Nothing fits with K untiled: tile K with the largest exact divisor.
        tn_min = tn_list[-1]
        for tk_try in (2048, 1024, 512, 256, 128):
            if tk_try < nx and nx % tk_try == 0:
                tm_try = shrink_tm(tm if tm is not None else 512, tn_min, tk_try, True)
                if vmem_use(tm_try, tn_min, tk_try, True) <= budget:
                    chosen = (tm_try, tn_min, tk_try, True)
                    break
    if chosen is None:
        # Last resort (huge nx with no 128-multiple divisor): minimal tiles and
        # rely on the raised vmem limit / compiler spill.
        chosen = (sub_min, tn_list[-1], tk_eff, tk_eff < nx)

    tm_eff, tn_eff, tk_eff, k_tiled = chosen
    resident = (tn_eff == nf) and (tk_eff == nx)

    gm = pl.cdiv(m, tm_eff)
    gn = pl.cdiv(nf, tn_eff)
    gk = pl.cdiv(nx, tk_eff)

    # ---------------- grid / specs per schedule ------------------------------
    if resident:
        # Keep >= 2 M grid steps when possible so both v7x TensorCores get work.
        if gm == 1 and m >= 2 * sub_min:
            tm_eff = _round_up((m + 1) // 2, sub_min)
            gm = pl.cdiv(m, tm_eff)

        grid = (gm,)
        in_specs = [
            pl.BlockSpec((tm_eff, nx), lambda i: (i, 0)),
            pl.BlockSpec((nx, nf), lambda i: (0, 0)),  # constant index -> DMA'd once
            pl.BlockSpec((1, nf), lambda i: (0, 0)),
        ]
        out_spec = pl.BlockSpec((tm_eff, nf), lambda i: (i, 0))
        scratch = []
        kernel = _make_noacc_kernel(compute_dtype)
        dims = ("parallel",)
        hbm_bytes = m * nx * x_item + nx * nf * w_item + nf * b_item + m * nf * o_item
    elif not k_tiled:
        # K untiled, N tiled.  Pick the grid order that minimizes HBM traffic:
        #   M-outer / N-inner : x read once, weight re-streamed gm times.
        #   N-outer / M-inner : weight read once, x re-streamed gn times.
        bytes_m_outer = m * nx * x_item + gm * nx * nf * w_item
        bytes_n_outer = gn * m * nx * x_item + nx * nf * w_item
        kernel = _make_noacc_kernel(compute_dtype)
        scratch = []
        dims = ("parallel", "parallel")
        if bytes_m_outer <= bytes_n_outer:
            grid = (gm, gn)
            in_specs = [
                pl.BlockSpec((tm_eff, nx), lambda i, j: (i, 0)),
                pl.BlockSpec((nx, tn_eff), lambda i, j: (0, j)),
                pl.BlockSpec((1, tn_eff), lambda i, j: (0, j)),
            ]
            out_spec = pl.BlockSpec((tm_eff, tn_eff), lambda i, j: (i, j))
            hbm_bytes = bytes_m_outer + nf * b_item + m * nf * o_item
        else:
            grid = (gn, gm)
            in_specs = [
                pl.BlockSpec((tm_eff, nx), lambda j, i: (i, 0)),
                pl.BlockSpec((nx, tn_eff), lambda j, i: (0, j)),
                pl.BlockSpec((1, tn_eff), lambda j, i: (0, j)),
            ]
            out_spec = pl.BlockSpec((tm_eff, tn_eff), lambda j, i: (i, j))
            hbm_bytes = bytes_n_outer + nf * b_item + m * nf * o_item
    else:
        # General case: K innermost reduction with an f32 VMEM accumulator.
        grid = (gm, gn, gk)
        in_specs = [
            pl.BlockSpec((tm_eff, tk_eff), lambda i, j, k: (i, k)),
            pl.BlockSpec((tk_eff, tn_eff), lambda i, j, k: (k, j)),
            pl.BlockSpec((1, tn_eff), lambda i, j, k: (0, j)),
        ]
        out_spec = pl.BlockSpec((tm_eff, tn_eff), lambda i, j, k: (i, j))
        scratch = [pltpu.VMEM((tm_eff, tn_eff), jnp.float32)]
        kernel = _make_acc_kernel(compute_dtype)
        dims = ("parallel", "parallel", "arbitrary")
        hbm_bytes = (gn * m * nx * x_item + gm * nx * nf * w_item
                     + nf * b_item + m * nf * o_item)

    est_use = vmem_use(tm_eff, tn_eff, tk_eff, k_tiled)
    vmem_limit = int(min(max(32 * _MiB, est_use * 5 // 4), int(cap * 0.9)))

    cost = pl.CostEstimate(
        flops=2 * m * nx * nf,
        transcendentals=0,
        bytes_accessed=int(hbm_bytes),
    )

    out = pl.pallas_call(
        kernel,
        out_shape=jax.ShapeDtypeStruct((m, nf), out_dtype),
        grid_spec=pltpu.PrefetchScalarGridSpec(
            num_scalar_prefetch=0,
            grid=grid,
            in_specs=in_specs,
            out_specs=out_spec,
            scratch_shapes=scratch,
        ),
        compiler_params=pltpu.CompilerParams(
            dimension_semantics=dims,
            vmem_limit_bytes=vmem_limit,
        ),
        cost_estimate=cost,
    )(x2d, w, bias2d)

    return out.reshape(*lead_shape, nf)


if __name__ == "__main__":
    key = jax.random.PRNGKey(0)
    k_x, k_w, k_x2, k_w2, k_b2, k_x3, k_w3, k_b3 = jax.random.split(key, 8)

    # --- Test 1: module-default init (N(0, 0.02) weight, zero bias), default
    # schedule: weight-resident, bf16 MXU operands, f32 accumulation. ---------
    batch, seq, nx, nf = 2, 8, 32, 64
    weight = 0.02 * jax.random.normal(k_w, (nx, nf), dtype=jnp.float32)
    bias = jnp.zeros((nf,), dtype=jnp.float32)
    x = jax.random.normal(k_x, (batch, seq, nx), dtype=jnp.float32)

    y = jax.block_until_ready(conv1d(x, weight, bias))
    y_ref = (x.reshape(-1, nx) @ weight + bias).reshape(batch, seq, nf)
    assert y.shape == (batch, seq, nf)
    assert jnp.allclose(y, y_ref, atol=2e-2, rtol=2e-2)

    # --- Test 2: ragged shapes + nonzero bias, exact f32 operands (matches
    # torch.addmm numerics; exercises masked/padded M and sub-128 N). --------
    b2, s2, nx2, nf2 = 3, 5, 48, 80
    w2 = 0.02 * jax.random.normal(k_w2, (nx2, nf2), dtype=jnp.float32)
    bias2 = 0.1 * jax.random.normal(k_b2, (nf2,), dtype=jnp.float32)
    x2 = jax.random.normal(k_x2, (b2, s2, nx2), dtype=jnp.float32)
    y2 = jax.block_until_ready(conv1d(x2, w2, bias2, mxu_dtype=None))
    y2_ref = (x2.reshape(-1, nx2) @ w2 + bias2).reshape(b2, s2, nf2)
    assert y2.shape == (b2, s2, nf2)
    assert jnp.allclose(y2, y2_ref, atol=1e-5, rtol=1e-5)

    # --- Test 3: force the N-tiled and K-tiled fallback schedules. -----------
    b3, s3, nx3, nf3 = 2, 32, 256, 384
    w3 = 0.02 * jax.random.normal(k_w3, (nx3, nf3), dtype=jnp.float32)
    bias3 = 0.1 * jax.random.normal(k_b3, (nf3,), dtype=jnp.float32)
    x3 = jax.random.normal(k_x3, (b3, s3, nx3), dtype=jnp.float32)
    y3_ref = (x3.reshape(-1, nx3) @ w3 + bias3).reshape(b3, s3, nf3)

    y3a = jax.block_until_ready(conv1d(x3, w3, bias3, tn=128, mxu_dtype=None))
    assert jnp.allclose(y3a, y3_ref, atol=1e-4, rtol=1e-4)

    y3b = jax.block_until_ready(conv1d(x3, w3, bias3, tn=128, tk=128, mxu_dtype=None))
    assert jnp.allclose(y3b, y3_ref, atol=1e-4, rtol=1e-4)

    print("KERNEL_OK")
</pallas_src>

<mosaic_0001>
module attributes {stable_mosaic.version = 11 : i64} {
  func.func @kernel(%arg0: i32, %arg1: memref<8x32xf32, #tpu.memory_space<vmem>>, %arg2: memref<32x64xbf16, #tpu.memory_space<vmem>>, %arg3: memref<1x64xf32, #tpu.memory_space<vmem>>, %arg4: memref<8x64xf32, #tpu.memory_space<vmem>>) attributes {dimension_semantics = [#tpu.dimension_semantics<parallel>], iteration_bounds = array<i64: 2>, scalar_prefetch = 0 : i64, scratch_operands = 0 : i64, tpu.core_type = #tpu.core_type<tc>, window_params = [{transform_indices = @transform_0, window_bounds = array<i64: 8, 32>}, {pipeline_mode = #tpu.pipeline_mode<synchronous>, transform_indices = @transform_1, window_bounds = array<i64: 32, 64>}, {pipeline_mode = #tpu.pipeline_mode<synchronous>, transform_indices = @transform_2, window_bounds = array<i64: 1, 64>}, {transform_indices = @transform_3, window_bounds = array<i64: 8, 64>}]} {
    %c0 = arith.constant 0 : index
    %c0_0 = arith.constant 0 : index
    %0 = vector.load %arg1[%c0, %c0_0] : memref<8x32xf32, #tpu.memory_space<vmem>>, vector<8x32xf32>
    %1 = arith.truncf %0 : vector<8x32xf32> to vector<8x32xbf16>
    %c0_1 = arith.constant 0 : index
    %c0_2 = arith.constant 0 : index
    %2 = vector.load %arg2[%c0_1, %c0_2] : memref<32x64xbf16, #tpu.memory_space<vmem>>, vector<32x64xbf16>
    %cst = arith.constant dense<0.000000e+00> : vector<8x64xf32>
    %3 = tpu.matmul %1, %2, %cst {dimension_numbers = #tpu.dot_dimension_numbers<[1], [0], [0], [1], [0, 0, 1, 1], [], []>} : vector<8x32xbf16>, vector<32x64xbf16>, vector<8x64xf32> -> vector<8x64xf32>
    %c0_3 = arith.constant 0 : index
    %c0_4 = arith.constant 0 : index
    %4 = vector.load %arg3[%c0_3, %c0_4] : memref<1x64xf32, #tpu.memory_space<vmem>>, vector<1x64xf32>
    %5 = vector.broadcast %4 : vector<1x64xf32> to vector<8x64xf32>
    %6 = arith.addf %3, %5 : vector<8x64xf32>
    %c0_5 = arith.constant 0 : index
    %c0_6 = arith.constant 0 : index
    %7 = vector.load %arg4[%c0_5, %c0_6] : memref<8x64xf32, #tpu.memory_space<vmem>>, vector<8x64xf32>
    tpu.vector_store %arg4[%c0_5, %c0_6], %6 {strides = array<i32>} : memref<8x64xf32, #tpu.memory_space<vmem>>, vector<8x64xf32>,
    return
  }
  func.func @transform_0(%arg0: i32) -> (i32, i32) {
    %c0_i32 = arith.constant 0 : i32
    %c0_i32_0 = arith.constant 0 : i32
    return %arg0, %c0_i32 : i32, i32
  }
  func.func @transform_1(%arg0: i32) -> (i32, i32) {
    %c0_i32 = arith.constant 0 : i32
    %c0_i32_0 = arith.constant 0 : i32
    %c0_i32_1 = arith.constant 0 : i32
    return %c0_i32, %c0_i32_0 : i32, i32
  }
  func.func @transform_2(%arg0: i32) -> (i32, i32) {
    %c0_i32 = arith.constant 0 : i32
    %c0_i32_0 = arith.constant 0 : i32
    %c0_i32_1 = arith.constant 0 : i32
    return %c0_i32, %c0_i32_0 : i32, i32
  }
  func.func @transform_3(%arg0: i32) -> (i32, i32) {
    %c0_i32 = arith.constant 0 : i32
    %c0_i32_0 = arith.constant 0 : i32
    return %arg0, %c0_i32 : i32, i32
  }
}

</mosaic_0001>

<bundles_post_ra>
// kernel: tpu_custom_call.1
= control target key start
LH: loop header
LB: loop body
LE: loop exit
PB: predicated region body
PF: predicated region fallthrough
CT: control target
= control target key end

     0   :  { %8 = vsyncpa [#allocation3], 0  ;;  %s815_s0 = inlined_call_operand.hbm [shape: f32[16,32], index: 0, kind: input, shape index: {}]   ;;  %s816_s1 = inlined_call_operand.hbm [shape: bf16[32,64], index: 1, kind: input, shape index: {}]   ;;  %s817_s2 = inlined_call_operand.vmem [shape: f32[1,64], index: 2, kind: input, shape index: {}]   ;;  %s818_s3 = inlined_call_operand.hbm [shape: f32[16,64], index: 3, kind: output, shape index: {}]  }
   0x1   :  { %10 = vsyncpa [#allocation3 + $0x1], 0 }
   0x2   :  { %11 = vsyncpa [#allocation6], 0 }
   0x3   :  { %12 = vsyncpa [#allocation4], 0 }
   0x4   :  { %14 = vsyncpa [#allocation4 + $0x1], 0  ;;  %s616_s12 = smov 0   ;;  %s618_s13 = smov 0  }
   0x5   :  { %s620_s14 = smov 0   ;;  %s622_s15 = smov 0  }
   0x6 LB: > { %s637_s16 = sadd.s32 4294967295, %s587_s15   ;;  %s367_s17 = sadd.s32 4294967294, %s587_s15   ;;  %s587_s15 = sphi %s622_s15, %s838_s15   ;;  %s583_s14 = sphi %s620_s14, %s837_s14   ;;  %s579_s13 = sphi %s618_s13, %s836_s13   ;;  %s575_s12 = sphi %s616_s12, %s835_s12  }
   0x7   : > { %p40_p0 = scmp.ne.s32.totalorder %s579_s13, %s575_s12  ;;  %p819_p1 = scmp.eq.s32.totalorder %s637_s16, 0 }
   0x8   : > { %p112_p3 = scmp.eq.s32.totalorder %s367_s17, 1  ;;  %p368_p5 = scmp.ge.s32.totalorder %s587_s15, 1 }
   0x9   : > { %p646_p4 = por %p819_p1, %p40_p0  ;;  %p119_p7 = scmp.lt.s32.totalorder %s587_s15, 3 }
   0xa   : > { %p651_p6 = por %p112_p3, %p40_p0  ;;  %s589_s21 = smov [#allocation5]  }
   0xb   : > { %s822_s18 = scalar_select %p646_p4, 1, 0 }
   0xc   : > { %s823_s19 = scalar_select %p651_p6, 1, 0 }
   0xd   : > { %p656_p8 = pnand %p368_p5, %p119_p7  ;;  %s131_s22 = sshll.u32 %s589_s21, 4  ;;  %s660_s22 = int_to_ptr.vmem [resolvable:$true] %s131_s22 }
   0xe   : > { %s672_s24 = sadd.s32 1, %s587_s15   ;;  %s27_s25 = sadd.s32 1, %s583_s14 }
   0xf   : > { %s824_s20 = scalar_select %p656_p8, 1, 0 }
  0x10   : > { %p404_p9 = pneg %p656_p8  ;;  %s24_s26 = ssub.s32 %s587_s15, %s672_s24 }
  0x11   : > { %s459_s29 = scalar_lea.hbm %s816_s1, 256 }
  0x12   : > { %p667_p11 = pnand %p404_p9, %p819_p1  ;;  %p460_p12 = scmp.ne.s32.totalorder %s816_s1, %s459_s29 }
  0x13   : > { %p466_p5 = scmp.lt.u32.totalorder %s459_s29, %s816_s1 }
  0x14   : > { %p461_p13 = pneg %p667_p11 }
  0x16   : > { %p462_p0 = pnand %p461_p13, %p460_p12 }
  0x18   : > { %p463_p3 = pneg %p462_p0 }
  0x1a   : > { %p468_p7 = pnand %p466_p5, %p463_p3 }
  0x1c   : > { %471 = shalt.err (!%p468_p7)
}
  0x1d   : > { %s472_s7 = scalar_lea.vmem %s660_s22, 256  ;;  %p480_p2 = scmp.lt.s32.totalorder %s660_s22, %s660_s22 }
  0x1e   : > { %p473_p9 = scmp.ne.s32.totalorder %s660_s22, %s472_s7  ;;  %p481_p6 = scmp.lt.s32.totalorder %s472_s7, %s472_s7 }
  0x20   : > { %p475_p10 = pnand %p473_p9, %p461_p13  ;;  %p482_p4 = por %p481_p6, %p480_p2 }
  0x22   : > { %p476_p1 = pneg %p475_p10 }
  0x24   : > { %p483_p8 = pnand %p482_p4, %p476_p1 }
  0x26   : > { %486 = shalt.err (!%p483_p8)
}
  0x27   : > { %s590_s8 = smov 64   ;;  %s591_s9 = smov 4  }
  0x28   : > { %407 = dma.hbm_to_vmem [thread:$0]  (!%p667_p11), %s816_s1, 256, %s660_s22, [#allocation6], %s590_s8, %s590_s8, %s591_s9  }
  0x29   : > { %p25_p2 = scmp.eq.s32.totalorder %s24_s26, 0  ;;  %p34_p1 = scmp.ne.s32.totalorder %s583_s14, %s579_s13 }
  0x2a   : > { %p35_p4 = scmp.eq.s32.totalorder %s587_s15, 0  ;;  %p417_p6 = scmp.lt.s32.totalorder %s587_s15, 2 }
  0x2b   : > { %s703_s17 = scalar_select %p25_p2, %s583_s14, %s27_s25  }
  0x2c   : > { %p36_p8 = por %p35_p4, %p34_p1  ;;  %p826_p10 = scmp.eq.s32.totalorder %s637_s16, 1 }
  0x2d   : > { %s148_s27 = sand.u32 1, %s583_s14   ;;  %s372_s28 = sshll.u32 %s587_s15, 7 }
  0x2e   : > { %p707_p12 = por %p826_p10, %p34_p1  ;;  %s371_s29 = sshll.u32 %s148_s27, 3 }
  0x2f   : > { %s716_s4 = scalar_lea.hbm %s815_s0, %s372_s28  ;;  %s152_s22 = scalar_lea.vmem [#allocation2], %s371_s29 }
  0x30   : > { %s159_s25 = sshll.u32 %s152_s22, 4  ;;  %p718_p11 = pnand %p417_p6, %p36_p8  ;;  %s722_s25 = int_to_ptr.vmem [resolvable:$true] %s159_s25 }
  0x31   : > { %s149_s5 = scalar_lea.sflag [#allocation3], %s148_s27  ;;  %s487_s6 = scalar_lea.hbm %s716_s4, 128 }
  0x32   : > { %p488_p13 = scmp.ne.s32.totalorder %s716_s4, %s487_s6  ;;  %p489_p0 = pneg %p718_p11 }
  0x33   : > { %s492_s9 = scalar_lea.hbm %s815_s0, 256  ;;  %p493_p7 = scmp.lt.u32.totalorder %s716_s4, %s815_s0 }
  0x34   : > { %p490_p3 = pnand %p489_p0, %p488_p13  ;;  %p494_p9 = scmp.lt.u32.totalorder %s492_s9, %s487_s6 }
  0x35   : > { %p496_p1 = scmp.lt.u32.totalorder %s487_s6, %s716_s4 }
  0x36   : > { %p491_p5 = pneg %p490_p3  ;;  %p495_p2 = por %p494_p9, %p493_p7 }
  0x38   : > { %p497_p4 = por %p496_p1, %p495_p2 }
  0x3a   : > { %p498_p6 = pnand %p497_p4, %p491_p5 }
  0x3c   : > { %501 = shalt.err (!%p498_p6)
}
  0x3d   : > { %s502_s27 = scalar_lea.vmem %s722_s25, 128  ;;  %s592_s28 = smov [#allocation2]  }
  0x3e   : > { %p503_p8 = scmp.ne.s32.totalorder %s722_s25, %s502_s27  ;;  %s507_s29 = sshll.u32 %s592_s28, 4  ;;  %s508_s29 = int_to_ptr.vmem [resolvable:$false] %s507_s29 }
  0x3f   : > { %s509_s23 = scalar_lea.vmem %s508_s29, 256  ;;  %p510_p3 = scmp.lt.s32.totalorder %s722_s25, %s508_s29 }
  0x40   : > { %p505_p10 = pnand %p503_p8, %p489_p0  ;;  %p511_p7 = scmp.lt.s32.totalorder %s509_s23, %s502_s27 }
  0x42   : > { %p506_p13 = pneg %p505_p10  ;;  %p512_p9 = por %p511_p7, %p510_p3 }
  0x44   : > { %p513_p2 = pnand %p512_p9, %p506_p13 }
  0x46   : > { %516 = shalt.err (!%p513_p2)
}
  0x47   : > { %411 = dma.hbm_to_vmem [thread:$0]  (!%p718_p11), %s716_s4, 128, %s722_s25, %s149_s5  }
  0x48   : > { %p829_p5 = scmp.ne.s32.totalorder %s824_s20, 0 }
  0x49   : > { %s752_s30 = sand.u32 (!%p829_p5), 1, %s579_s13   ;;  %p830_p0 = scmp.ne.s32.totalorder (!%p829_p5), %s822_s18, 0 }
  0x4a   : > { %168 = sbr.rel (%p829_p5) target bundleno = 322 (0x142), region = 32  ;;  %s374_s22 = sshll.u32 (!%p829_p5), %s752_s30, 3 }
  0x4b   : > { %s171_s6 = scalar_lea.sflag (!%p829_p5), [#allocation3], %s752_s30  ;;  %s174_s7 = scalar_lea.vmem (!%p829_p5), [#allocation2], %s374_s22 }
  0x51   : > { %562 = dma.done.wait (%p830_p0), %s171_s6, 128  }
  0x52   : > { %564 = vsyncadd (%p830_p0), %s171_s6, 4294967168  ;;  %p831_p1 = scmp.eq.s32.totalorder %s637_s16, 0 }
  0x54   : > { %566 = dma.done.wait (%p831_p1), [#allocation6], 256   ;;  %p832_p11 = pmov %p831_p1 }
  0x55   : > { %v593_v0 = vmov 0.0   ;;  %vm594_vm0 = vmmov 0   ;;  %v457_v1 = vld [vmem:[#allocation5] sm:$0xff]   ;;  %v458_v2 = vld [vmem:[#allocation5 + $0x8] sm:$0xff]   ;;  %v202_v3 = vld [vmem:[%s174_s7] sm:$0xff]  ;;  %vm227_vm1 = vcmask 261120  }
  0x56   : > { %568 = vsyncadd (%p832_p11), [#allocation6], 4294967040  ;;  %388 = vmatprep.subr.bf16.mxu0 %v593_v0  ;;  %392 = vmatprep.mubr.msk.bf16.mxu0 %vm594_vm0, %v593_v0  ;;  %v203_v4 = vpack.c.bf16 %v202_v3, %v202_v3  ;;  %v377_v5 = vld [vmem:[%s817_s2] ss:$0 sm:$0xff]  ;;  %s382_s4 = sshll.u32 %s637_s16, 7  ;;  %s200_s25 = scalar_lea.vmem [#allocation7], %s374_s22 }
  0x57   : > { %389 = vmatpush3.bf16.msra.mxu0 %v457_v1  ;;  %s287_s26 = sshll.u32 %s200_s25, 4  ;;  %vm271_vm2 = vcmask 523264   ;;  %s771_s9 = scalar_lea.hbm %s818_s3, %s382_s4  ;;  %s773_s26 = int_to_ptr.vmem [resolvable:$true] %s287_s26 }
  0x58   : > { %390 = vmatprep.subr.bf16.mxu0 %v593_v0  ;;  %s274_s16 = scalar_lea.sflag [#allocation4], %s752_s30  ;;  %s517_s10 = scalar_lea.vmem %s773_s26, 128 }
  0x59   : > { %p518_p4 = scmp.ne.s32.totalorder %s773_s26, %s517_s10  ;;  %s595_s11 = smov [#allocation7]  }
  0x5a   : > { %s521_s27 = sshll.u32 %s595_s11, 4  ;;  %s522_s27 = int_to_ptr.vmem [resolvable:$false] %s521_s27 }
  0x5b   : > { %391 = vmatpush3.bf16.msra.mxu0 %v458_v2  ;;  %p519_p6 = pnand %p518_p4, %p707_p12  ;;  %s523_s28 = scalar_lea.vmem %s522_s27, 256 }
  0x5c   : > { %p524_p10 = scmp.lt.s32.totalorder %s773_s26, %s522_s27  ;;  %p525_p13 = scmp.lt.s32.totalorder %s523_s28, %s517_s10 }
  0x5d   : > { %p520_p8 = pneg %p519_p6 }
  0x5e   : > { %393 = vmatmul.mubr.msk.bf16.vlgmr.msra.gmra.mrb[0].mxu0 %vm227_vm1, %v203_v4  ;;  %p526_p3 = por %p525_p13, %p524_p10 }
  0x60   : > { %p527_p7 = pnand %p526_p3, %p520_p8 }
 0x131   : > { %v265_v6 = vpop.f32.mrb[0].mxu0 }
 0x132   : > { %v266_v7 = vadd.f32 %v377_v5, %v265_v6  ;;  %v394_v8 = vpop.f32.mrb[1].mxu0 }
 0x133   : > { %v268_v9 = vpop.f32.mrb[2].mxu0 }
 0x134   : > { %v395_v10 = vpop.f32.mrb[3].mxu0  ;;  %272 = vst.msk [vmem:[%s200_s25] sm:$0xff] %vm271_vm2, %v266_v7 }
 0x135   : > { %530 = shalt.err (!%p527_p7)
}
 0x136   : > { %s531_s29 = scalar_lea.hbm %s771_s9, 128  ;;  %s535_s22 = scalar_lea.hbm %s818_s3, 256 }
 0x137   : > { %p532_p9 = scmp.ne.s32.totalorder %s771_s9, %s531_s29  ;;  %p536_p0 = scmp.lt.u32.totalorder %s771_s9, %s818_s3 }
 0x138   : > { %p537_p1 = scmp.lt.u32.totalorder %s535_s22, %s531_s29  ;;  %p539_p4 = scmp.lt.u32.totalorder %s531_s29, %s771_s9 }
 0x139   : > { %p533_p2 = pnand %p532_p9, %p707_p12 }
 0x13a   : > { %p538_p11 = por %p537_p1, %p536_p0 }
 0x13b   : > { %p534_p5 = pneg %p533_p2 }
 0x13c   : > { %p540_p6 = por %p539_p4, %p538_p11 }
 0x13e   : > { %p541_p8 = pnand %p540_p6, %p534_p5 }
 0x140   : > { %544 = shalt.err (!%p541_p8)
}
 0x141   : > { %402 = dma.vmem_to_hbm [thread:$0]  (%p707_p12), %s773_s26, 128, %s771_s9, %s274_s16  }
 0x142 PF: > { %s299_s18 = sand.u32 1, %s575_s12   ;;  %p833_p10 = scmp.ne.s32.totalorder %s823_s19, 0 }
 0x143   : > { %p834_p13 = scmp.ge.s32.totalorder %s587_s15, 2  ;;  %s300_s20 = scalar_lea.sflag [#allocation4], %s299_s18 }
 0x145   : > { %p413_p3 = pnand %p834_p13, %p833_p10 }
 0x147   : > { %570 = dma.done.wait (!%p413_p3), %s300_s20, 128  }
 0x148   : > { %572 = vsyncadd (!%p413_p3), %s300_s20, 4294967168  ;;  %p17_p7 = scmp.ge.s32.totalorder %s672_s24, 4   ;;  %s835_s12 = smov %s579_s13 }
 0x149   : > { %s836_s13 = smov %s583_s14  ;;  %s837_s14 = smov %s703_s17 }
 0x14a   : > { %s838_s15 = smov %s672_s24  ;;  %19 = sbr.rel (!%p17_p7) target bundleno = 6 (0x6), region = 81 }
 0x151   :  { %305 = vsyncpa [#allocation3], 1 }
 0x152   :  { %307 = vsyncpa [#allocation3 + $0x1], 1 }
 0x153   :  { %308 = vsyncpa [#allocation6], 1 }
 0x154   :  { %309 = vsyncpa [#allocation4], 1 }
 0x155   :  { %311 = vsyncpa [#allocation4 + $0x1], 1 }

</bundles_post_ra>
